<compile_context>
chip_gen: v6e
topology: v6e:2x2x1
jax: 0.10.0
libtpu: 0.0.40
codegen_flags: <defaults>
</compile_context>

<pallas_src>
import jax
import jax.numpy as jnp
import numpy as np
from jax.experimental import pallas as pl
from jax.experimental.pallas import tpu as pltpu


# ----------------------------- diffusion schedule (glue, plain JAX) -----------------------------

def linear_beta_schedule(timesteps):
    if timesteps < 10:
        raise ValueError("Warning: Less than 10 timesteps require adjustments to this schedule!")
    beta_start = 0.0001 * (500 / timesteps)
    beta_end = 0.02 * (500 / timesteps)
    betas = jnp.linspace(beta_start, beta_end, timesteps)
    return jnp.clip(betas, 0.0001, 0.9999)


def make_diffusion_buffers(timesteps):
    betas = linear_beta_schedule(timesteps)                      # (T,)
    alphas = 1.0 - betas
    alphas_cumprod = jnp.cumprod(alphas, axis=0)
    sqrt_alphas_cumprod = jnp.sqrt(alphas_cumprod)               # (T,)
    sqrt_one_minus_alphas_cumprod = jnp.sqrt(1.0 - alphas_cumprod)
    loss_weight = jnp.sqrt(alphas) * jnp.sqrt(1.0 - alphas_cumprod) / betas / 100.0
    return {
        "sqrtAlphasCumprod": sqrt_alphas_cumprod.astype(jnp.float32),
        "sqrtOneMinusAlphasCumprod": sqrt_one_minus_alphas_cumprod.astype(jnp.float32),
        # kept with the torch (T,1,1,1) broadcast shape so loss_weight[t] -> (N,1,1,1)
        "loss_weight": loss_weight.astype(jnp.float32).reshape(timesteps, 1, 1, 1),
    }


# ----------------------------- Pallas kernel: fused q_sample + 1x1-conv denoiser -----------------------------

def fused_qsample_conv1x1(sac_t, soma_t, w_flat, b, cond_f, x_f, noise_f):
    """Single-invocation fused kernel for the whole batch.

    sac_t, soma_t : (N, 1) f32   per-sample schedule scalars (gathered in XLA)
    w_flat        : (C_out*C_in,) f32   1x1-conv weight, row-major, read as SMEM scalars
    b             : (C_out,) f32        bias, read as SMEM scalars
    cond_f        : (N, Cc, HW) f32
    x_f           : (N, Cd, HW) f32
    noise_f       : (N, Cc+Cd, HW) f32
    returns       : (N, C_out, HW) f32
    """
    N, Cc, HW = cond_f.shape
    Cd = x_f.shape[1]
    Ct = Cc + Cd
    C_out = b.shape[0]

    def kernel(sac_ref, soma_ref, w_ref, b_ref, cond_ref, x_ref, noise_ref, out_ref):
        sac = sac_ref[...]          # (N, 1) -> lane-broadcast over HW
        soma = soma_ref[...]        # (N, 1)

        # q_sample per input channel (implicit concat of cond and x):
        #   noisy[c] = sac * x_and_c[:, c, :] + soma * noise[:, c, :]
        # Each column is a lane-dense (N, HW) slab; all work stays on the VPU.
        noisy = []
        for c in range(Cc):
            noisy.append(sac * cond_ref[:, c, :] + soma * noise_ref[:, c, :])
        for c in range(Cd):
            noisy.append(sac * x_ref[:, c, :] + soma * noise_ref[:, Cc + c, :])

        # 1x1-conv denoiser stand-in: C_out x C_in scalar-broadcast FMAs
        # (weights/bias as SMEM scalars; no MXU push/pop for this tiny matmul).
        for o in range(C_out):
            acc = noisy[0] * w_ref[o * Ct + 0]
            for c in range(1, Ct):
                acc = acc + noisy[c] * w_ref[o * Ct + c]
            out_ref[:, o, :] = (acc + b_ref[o]).astype(out_ref.dtype)

    return pl.pallas_call(
        kernel,
        out_shape=jax.ShapeDtypeStruct((N, C_out, HW), jnp.float32),
        in_specs=[
            pl.BlockSpec(memory_space=pltpu.VMEM),   # sac_t  (N,1)
            pl.BlockSpec(memory_space=pltpu.VMEM),   # soma_t (N,1)
            pl.BlockSpec(memory_space=pltpu.SMEM),   # weight (flat, scalar reads)
            pl.BlockSpec(memory_space=pltpu.SMEM),   # bias   (scalar reads)
            pl.BlockSpec(memory_space=pltpu.VMEM),   # cond   (N,Cc,HW)
            pl.BlockSpec(memory_space=pltpu.VMEM),   # x      (N,Cd,HW)
            pl.BlockSpec(memory_space=pltpu.VMEM),   # noise  (N,Ct,HW)
        ],
        out_specs=pl.BlockSpec(memory_space=pltpu.VMEM),
    )(sac_t, soma_t, w_flat, b, cond_f, x_f, noise_f)


# ----------------------------- DiffusionDirect forward (training branch, twin_tower=False) -----------------------------

def diffusion_direct_forward(params, conditioning, data, key):
    """conditioning: (B, S, C_cond, H, W); data: (B, S, C_data, H, W). Returns the
    training-mode tuple (noise, predicted_x, x, loss_weight[t], interm_features) plus t."""
    B, S = data.shape[0], data.shape[1]
    Cd, H, W = data.shape[2], data.shape[3], data.shape[4]
    Cc = conditioning.shape[2]
    N = B * S
    Ct = Cc + Cd
    HW = H * W

    x = data.reshape(N, Cd, H, W)                   # (N, Cd, H, W)
    cond = conditioning.reshape(N, Cc, H, W)        # (N, Cc, H, W)

    k_noise, k_t = jax.random.split(key)
    # noise over the (cond, x) channel-concat shape -- generated once, never concatenated in HBM
    noise = jax.random.normal(k_noise, (N, Ct, H, W), dtype=jnp.float32)
    t = jax.random.randint(k_t, (N,), 0, params["timesteps"]).astype(jnp.int32)

    # per-sample schedule scalars: cheap XLA gather, shaped (N,1) for lane-broadcast in-kernel
    sac_t = params["sqrtAlphasCumprod"][t].reshape(N, 1)
    soma_t = params["sqrtOneMinusAlphasCumprod"][t].reshape(N, 1)

    pred_f = fused_qsample_conv1x1(
        sac_t, soma_t,
        params["unet1_w"].reshape(-1),              # (C_out*C_in,)
        params["unet1_b"],                          # (C_out,)
        cond.reshape(N, Cc, HW),                    # free reshapes (contiguous)
        x.reshape(N, Cd, HW),
        noise.reshape(N, Ct, HW),
    )                                               # (N, C_out, HW)

    # reshape back to (B, S, ...) exactly as the torch module does
    predicted_out = pred_f.reshape(B, S, -1, H, W)
    noise_out = noise.reshape(B, S, Ct, H, W)
    x_out = x.reshape(B, S, Cd, H, W)
    loss_w = params["loss_weight"][t]               # (N, 1, 1, 1)

    # TODO(synk): Unet intermediate-feature dicts not reproducible (Unet source not provided)
    interm_features = {"UNet1": {}, "UNet2": {}}
    return noise_out, predicted_out, x_out, loss_w, interm_features, t


# ----------------------------- main -----------------------------

if __name__ == "__main__":
    # small config implied by the module
    timesteps = 10
    data_channels = 2
    input_steps = 2
    cond_channels = input_steps * data_channels      # 4
    out_channels = data_channels                     # 2
    B, S, H, W = 2, 2, 16, 16

    key = jax.random.PRNGKey(0)
    k_cond, k_data, k_w, k_fwd = jax.random.split(key, 4)

    conditioning = jax.random.normal(k_cond, (B, S, cond_channels, H, W), dtype=jnp.float32)
    data = jax.random.normal(k_data, (B, S, data_channels, H, W), dtype=jnp.float32)

    # deterministic parameter init (stand-in denoiser 1x1 conv)
    C_in = cond_channels + data_channels
    w1 = jax.random.normal(k_w, (out_channels, C_in), dtype=jnp.float32) * 0.1
    b1 = jnp.zeros((out_channels,), dtype=jnp.float32)

    buffers = make_diffusion_buffers(timesteps)
    params = {
        "timesteps": timesteps,
        "sqrtAlphasCumprod": buffers["sqrtAlphasCumprod"],
        "sqrtOneMinusAlphasCumprod": buffers["sqrtOneMinusAlphasCumprod"],
        "loss_weight": buffers["loss_weight"],
        "unet1_w": w1,
        "unet1_b": b1,
    }

    (noise_out, predicted_out, x_out, loss_w, interm, t_used) = diffusion_direct_forward(
        params, conditioning, data, k_fwd)
    jax.block_until_ready(predicted_out)

    # pure-JAX reference for the fused kernel (q_sample + 1x1 conv)
    N = B * S
    xc = jnp.concatenate(
        [conditioning.reshape(N, cond_channels, H, W), data.reshape(N, data_channels, H, W)],
        axis=1)
    noise_flat = noise_out.reshape(N, C_in, H, W)
    sac_t = params["sqrtAlphasCumprod"][t_used][:, None, None, None]
    soma_t = params["sqrtOneMinusAlphasCumprod"][t_used][:, None, None, None]
    noisy_ref = sac_t * xc + soma_t * noise_flat
    pred_ref = jnp.einsum("oc,nchw->nohw", w1, noisy_ref) + b1[None, :, None, None]
    pred_ref = pred_ref.reshape(B, S, out_channels, H, W)

    np.testing.assert_allclose(np.asarray(predicted_out), np.asarray(pred_ref),
                               rtol=1e-5, atol=1e-5)
    assert noise_out.shape == (B, S, cond_channels + data_channels, H, W)
    assert x_out.shape == (B, S, data_channels, H, W)
    assert predicted_out.shape == (B, S, data_channels, H, W)
    assert loss_w.shape == (B * S, 1, 1, 1)

    print("KERNEL_OK")
</pallas_src>

<mosaic_0001>
module attributes {stable_mosaic.version = 11 : i64} {
  func.func @kernel(%arg0: memref<4x1xf32, #tpu.memory_space<vmem>>, %arg1: memref<4x1xf32, #tpu.memory_space<vmem>>, %arg2: memref<12xf32, #tpu.memory_space<smem>>, %arg3: memref<2xf32, #tpu.memory_space<smem>>, %arg4: memref<4x4x256xf32, #tpu.memory_space<vmem>>, %arg5: memref<4x2x256xf32, #tpu.memory_space<vmem>>, %arg6: memref<4x6x256xf32, #tpu.memory_space<vmem>>, %arg7: memref<4x2x256xf32, #tpu.memory_space<vmem>>) attributes {dimension_semantics = [], scalar_prefetch = 0 : i64, scratch_operands = 0 : i64, tpu.core_type = #tpu.core_type<tc>} {
    %c0 = arith.constant 0 : index
    %c0_0 = arith.constant 0 : index
    %0 = vector.load %arg0[%c0, %c0_0] : memref<4x1xf32, #tpu.memory_space<vmem>>, vector<4x1xf32>
    %c0_1 = arith.constant 0 : index
    %c0_2 = arith.constant 0 : index
    %1 = vector.load %arg1[%c0_1, %c0_2] : memref<4x1xf32, #tpu.memory_space<vmem>>, vector<4x1xf32>
    %c0_3 = arith.constant 0 : index
    %c0_4 = arith.constant 0 : index
    %c0_5 = arith.constant 0 : index
    %2 = vector.load %arg4[%c0_3, %c0_4, %c0_5] : memref<4x4x256xf32, #tpu.memory_space<vmem>>, vector<4x1x256xf32>
    %3 = vector.shape_cast %2 : vector<4x1x256xf32> to vector<4x256xf32>
    %4 = vector.broadcast %0 : vector<4x1xf32> to vector<4x256xf32>
    %5 = arith.mulf %4, %3 : vector<4x256xf32>
    %c0_6 = arith.constant 0 : index
    %c0_7 = arith.constant 0 : index
    %c0_8 = arith.constant 0 : index
    %6 = vector.load %arg6[%c0_6, %c0_7, %c0_8] : memref<4x6x256xf32, #tpu.memory_space<vmem>>, vector<4x1x256xf32>
    %7 = vector.shape_cast %6 : vector<4x1x256xf32> to vector<4x256xf32>
    %8 = vector.broadcast %1 : vector<4x1xf32> to vector<4x256xf32>
    %9 = arith.mulf %8, %7 : vector<4x256xf32>
    %10 = arith.addf %5, %9 : vector<4x256xf32>
    %c0_9 = arith.constant 0 : index
    %c1 = arith.constant 1 : index
    %c0_10 = arith.constant 0 : index
    %11 = vector.load %arg4[%c0_9, %c1, %c0_10] : memref<4x4x256xf32, #tpu.memory_space<vmem>>, vector<4x1x256xf32>
    %12 = vector.shape_cast %11 : vector<4x1x256xf32> to vector<4x256xf32>
    %13 = vector.broadcast %0 : vector<4x1xf32> to vector<4x256xf32>
    %14 = arith.mulf %13, %12 : vector<4x256xf32>
    %c0_11 = arith.constant 0 : index
    %c1_12 = arith.constant 1 : index
    %c0_13 = arith.constant 0 : index
    %15 = vector.load %arg6[%c0_11, %c1_12, %c0_13] : memref<4x6x256xf32, #tpu.memory_space<vmem>>, vector<4x1x256xf32>
    %16 = vector.shape_cast %15 : vector<4x1x256xf32> to vector<4x256xf32>
    %17 = vector.broadcast %1 : vector<4x1xf32> to vector<4x256xf32>
    %18 = arith.mulf %17, %16 : vector<4x256xf32>
    %19 = arith.addf %14, %18 : vector<4x256xf32>
    %c0_14 = arith.constant 0 : index
    %c2 = arith.constant 2 : index
    %c0_15 = arith.constant 0 : index
    %20 = vector.load %arg4[%c0_14, %c2, %c0_15] : memref<4x4x256xf32, #tpu.memory_space<vmem>>, vector<4x1x256xf32>
    %21 = vector.shape_cast %20 : vector<4x1x256xf32> to vector<4x256xf32>
    %22 = vector.broadcast %0 : vector<4x1xf32> to vector<4x256xf32>
    %23 = arith.mulf %22, %21 : vector<4x256xf32>
    %c0_16 = arith.constant 0 : index
    %c2_17 = arith.constant 2 : index
    %c0_18 = arith.constant 0 : index
    %24 = vector.load %arg6[%c0_16, %c2_17, %c0_18] : memref<4x6x256xf32, #tpu.memory_space<vmem>>, vector<4x1x256xf32>
    %25 = vector.shape_cast %24 : vector<4x1x256xf32> to vector<4x256xf32>
    %26 = vector.broadcast %1 : vector<4x1xf32> to vector<4x256xf32>
    %27 = arith.mulf %26, %25 : vector<4x256xf32>
    %28 = arith.addf %23, %27 : vector<4x256xf32>
    %c0_19 = arith.constant 0 : index
    %c3 = arith.constant 3 : index
    %c0_20 = arith.constant 0 : index
    %29 = vector.load %arg4[%c0_19, %c3, %c0_20] : memref<4x4x256xf32, #tpu.memory_space<vmem>>, vector<4x1x256xf32>
    %30 = vector.shape_cast %29 : vector<4x1x256xf32> to vector<4x256xf32>
    %31 = vector.broadcast %0 : vector<4x1xf32> to vector<4x256xf32>
    %32 = arith.mulf %31, %30 : vector<4x256xf32>
    %c0_21 = arith.constant 0 : index
    %c3_22 = arith.constant 3 : index
    %c0_23 = arith.constant 0 : index
    %33 = vector.load %arg6[%c0_21, %c3_22, %c0_23] : memref<4x6x256xf32, #tpu.memory_space<vmem>>, vector<4x1x256xf32>
    %34 = vector.shape_cast %33 : vector<4x1x256xf32> to vector<4x256xf32>
    %35 = vector.broadcast %1 : vector<4x1xf32> to vector<4x256xf32>
    %36 = arith.mulf %35, %34 : vector<4x256xf32>
    %37 = arith.addf %32, %36 : vector<4x256xf32>
    %c0_24 = arith.constant 0 : index
    %c0_25 = arith.constant 0 : index
    %c0_26 = arith.constant 0 : index
    %38 = vector.load %arg5[%c0_24, %c0_25, %c0_26] : memref<4x2x256xf32, #tpu.memory_space<vmem>>, vector<4x1x256xf32>
    %39 = vector.shape_cast %38 : vector<4x1x256xf32> to vector<4x256xf32>
    %40 = vector.broadcast %0 : vector<4x1xf32> to vector<4x256xf32>
    %41 = arith.mulf %40, %39 : vector<4x256xf32>
    %c0_27 = arith.constant 0 : index
    %c4 = arith.constant 4 : index
    %c0_28 = arith.constant 0 : index
    %42 = vector.load %arg6[%c0_27, %c4, %c0_28] : memref<4x6x256xf32, #tpu.memory_space<vmem>>, vector<4x1x256xf32>
    %43 = vector.shape_cast %42 : vector<4x1x256xf32> to vector<4x256xf32>
    %44 = vector.broadcast %1 : vector<4x1xf32> to vector<4x256xf32>
    %45 = arith.mulf %44, %43 : vector<4x256xf32>
    %46 = arith.addf %41, %45 : vector<4x256xf32>
    %c0_29 = arith.constant 0 : index
    %c1_30 = arith.constant 1 : index
    %c0_31 = arith.constant 0 : index
    %47 = vector.load %arg5[%c0_29, %c1_30, %c0_31] : memref<4x2x256xf32, #tpu.memory_space<vmem>>, vector<4x1x256xf32>
    %48 = vector.shape_cast %47 : vector<4x1x256xf32> to vector<4x256xf32>
    %49 = vector.broadcast %0 : vector<4x1xf32> to vector<4x256xf32>
    %50 = arith.mulf %49, %48 : vector<4x256xf32>
    %c0_32 = arith.constant 0 : index
    %c5 = arith.constant 5 : index
    %c0_33 = arith.constant 0 : index
    %51 = vector.load %arg6[%c0_32, %c5, %c0_33] : memref<4x6x256xf32, #tpu.memory_space<vmem>>, vector<4x1x256xf32>
    %52 = vector.shape_cast %51 : vector<4x1x256xf32> to vector<4x256xf32>
    %53 = vector.broadcast %1 : vector<4x1xf32> to vector<4x256xf32>
    %54 = arith.mulf %53, %52 : vector<4x256xf32>
    %55 = arith.addf %50, %54 : vector<4x256xf32>
    %c0_34 = arith.constant 0 : index
    %56 = memref.load %arg2[%c0_34] : memref<12xf32, #tpu.memory_space<smem>>
    %57 = vector.broadcast %56 : f32 to vector<4x256xf32>
    %58 = arith.mulf %10, %57 : vector<4x256xf32>
    %c1_35 = arith.constant 1 : index
    %59 = memref.load %arg2[%c1_35] : memref<12xf32, #tpu.memory_space<smem>>
    %60 = vector.broadcast %59 : f32 to vector<4x256xf32>
    %61 = arith.mulf %19, %60 : vector<4x256xf32>
    %62 = arith.addf %58, %61 : vector<4x256xf32>
    %c2_36 = arith.constant 2 : index
    %63 = memref.load %arg2[%c2_36] : memref<12xf32, #tpu.memory_space<smem>>
    %64 = vector.broadcast %63 : f32 to vector<4x256xf32>
    %65 = arith.mulf %28, %64 : vector<4x256xf32>
    %66 = arith.addf %62, %65 : vector<4x256xf32>
    %c3_37 = arith.constant 3 : index
    %67 = memref.load %arg2[%c3_37] : memref<12xf32, #tpu.memory_space<smem>>
    %68 = vector.broadcast %67 : f32 to vector<4x256xf32>
    %69 = arith.mulf %37, %68 : vector<4x256xf32>
    %70 = arith.addf %66, %69 : vector<4x256xf32>
    %c4_38 = arith.constant 4 : index
    %71 = memref.load %arg2[%c4_38] : memref<12xf32, #tpu.memory_space<smem>>
    %72 = vector.broadcast %71 : f32 to vector<4x256xf32>
    %73 = arith.mulf %46, %72 : vector<4x256xf32>
    %74 = arith.addf %70, %73 : vector<4x256xf32>
    %c5_39 = arith.constant 5 : index
    %75 = memref.load %arg2[%c5_39] : memref<12xf32, #tpu.memory_space<smem>>
    %76 = vector.broadcast %75 : f32 to vector<4x256xf32>
    %77 = arith.mulf %55, %76 : vector<4x256xf32>
    %78 = arith.addf %74, %77 : vector<4x256xf32>
    %c0_40 = arith.constant 0 : index
    %79 = memref.load %arg3[%c0_40] : memref<2xf32, #tpu.memory_space<smem>>
    %80 = vector.broadcast %79 : f32 to vector<4x256xf32>
    %81 = arith.addf %78, %80 : vector<4x256xf32>
    %c0_41 = arith.constant 0 : index
    %c0_42 = arith.constant 0 : index
    %c0_43 = arith.constant 0 : index
    %82 = vector.load %arg7[%c0_41, %c0_42, %c0_43] : memref<4x2x256xf32, #tpu.memory_space<vmem>>, vector<4x1x256xf32>
    %83 = vector.shape_cast %82 : vector<4x1x256xf32> to vector<4x256xf32>
    %84 = vector.shape_cast %81 : vector<4x256xf32> to vector<4x1x256xf32>
    tpu.vector_store %arg7[%c0_41, %c0_42, %c0_43], %84 {strides = array<i32>} : memref<4x2x256xf32, #tpu.memory_space<vmem>>, vector<4x1x256xf32>,
    %c6 = arith.constant 6 : index
    %85 = memref.load %arg2[%c6] : memref<12xf32, #tpu.memory_space<smem>>
    %86 = vector.broadcast %85 : f32 to vector<4x256xf32>
    %87 = arith.mulf %10, %86 : vector<4x256xf32>
    %c7 = arith.constant 7 : index
    %88 = memref.load %arg2[%c7] : memref<12xf32, #tpu.memory_space<smem>>
    %89 = vector.broadcast %88 : f32 to vector<4x256xf32>
    %90 = arith.mulf %19, %89 : vector<4x256xf32>
    %91 = arith.addf %87, %90 : vector<4x256xf32>
    %c8 = arith.constant 8 : index
    %92 = memref.load %arg2[%c8] : memref<12xf32, #tpu.memory_space<smem>>
    %93 = vector.broadcast %92 : f32 to vector<4x256xf32>
    %94 = arith.mulf %28, %93 : vector<4x256xf32>
    %95 = arith.addf %91, %94 : vector<4x256xf32>
    %c9 = arith.constant 9 : index
    %96 = memref.load %arg2[%c9] : memref<12xf32, #tpu.memory_space<smem>>
    %97 = vector.broadcast %96 : f32 to vector<4x256xf32>
    %98 = arith.mulf %37, %97 : vector<4x256xf32>
    %99 = arith.addf %95, %98 : vector<4x256xf32>
    %c10 = arith.constant 10 : index
    %100 = memref.load %arg2[%c10] : memref<12xf32, #tpu.memory_space<smem>>
    %101 = vector.broadcast %100 : f32 to vector<4x256xf32>
    %102 = arith.mulf %46, %101 : vector<4x256xf32>
    %103 = arith.addf %99, %102 : vector<4x256xf32>
    %c11 = arith.constant 11 : index
    %104 = memref.load %arg2[%c11] : memref<12xf32, #tpu.memory_space<smem>>
    %105 = vector.broadcast %104 : f32 to vector<4x256xf32>
    %106 = arith.mulf %55, %105 : vector<4x256xf32>
    %107 = arith.addf %103, %106 : vector<4x256xf32>
    %c1_44 = arith.constant 1 : index
    %108 = memref.load %arg3[%c1_44] : memref<2xf32, #tpu.memory_space<smem>>
    %109 = vector.broadcast %108 : f32 to vector<4x256xf32>
    %110 = arith.addf %107, %109 : vector<4x256xf32>
    %c0_45 = arith.constant 0 : index
    %c1_46 = arith.constant 1 : index
    %c0_47 = arith.constant 0 : index
    %111 = vector.load %arg7[%c0_45, %c1_46, %c0_47] : memref<4x2x256xf32, #tpu.memory_space<vmem>>, vector<4x1x256xf32>
    %112 = vector.shape_cast %111 : vector<4x1x256xf32> to vector<4x256xf32>
    %113 = vector.shape_cast %110 : vector<4x256xf32> to vector<4x1x256xf32>
    tpu.vector_store %arg7[%c0_45, %c1_46, %c0_47], %113 {strides = array<i32>} : memref<4x2x256xf32, #tpu.memory_space<vmem>>, vector<4x1x256xf32>,
    return
  }
}

</mosaic_0001>

<bundles_post_ra>
// kernel: tpu_custom_call.1
= control target key start
LH: loop header
LB: loop body
LE: loop exit
PB: predicated region body
PF: predicated region fallthrough
CT: control target
= control target key end

     0   :  { %12 = vsyncpa [#allocation4], 0  ;;  %s1313_s0 = inlined_call_operand.vmem [shape: f32[4,1], index: 0, kind: input, shape index: {}]   ;;  %s1314_s1 = inlined_call_operand.vmem [shape: f32[4,1], index: 1, kind: input, shape index: {}]   ;;  %s1315_s2 = inlined_call_operand.vmem [shape: f32[12], index: 2, kind: input, shape index: {}]   ;;  %s1316_s3 = inlined_call_operand.vmem [shape: f32[2], index: 3, kind: input, shape index: {}]   ;;  %s1317_s4 = inlined_call_operand.vmem [shape: f32[4,4,256], index: 4, kind: input, shape index: {}]   ;;  %s1318_s5 = inlined_call_operand.vmem [shape: f32[4,2,256], index: 5, kind: input, shape index: {}]   ;;  %s1319_s6 = inlined_call_operand.vmem [shape: f32[4,6,256], index: 6, kind: input, shape index: {}]   ;;  %s1320_s7 = inlined_call_operand.hbm [shape: f32[4,2,256], index: 7, kind: output, shape index: {}]  }
   0x1   :  { %13 = vsyncpa [#allocation6], 0 }
   0x2   :  { %14 = vsyncpa [#allocation3], 0  ;;  %s25_s26 = sshll.u32 %s1315_s2, 4  ;;  %s35_s29 = sshll.u32 %s1316_s3, 4  ;;  %s26_s26 = int_to_ptr.vmem [resolvable:$true] %s25_s26  ;;  %s36_s29 = int_to_ptr.vmem [resolvable:$true] %s35_s29 }
   0x3   :  { %s889_s30 = scalar_lea.vmem %s26_s26, 16  ;;  %p894_p1 = scmp.lt.s32.totalorder %s26_s26, %s26_s26 }
   0x4   :  { %p890_p0 = scmp.ne.s32.totalorder %s26_s26, %s889_s30  ;;  %p895_p2 = scmp.lt.s32.totalorder %s889_s30, %s889_s30 }
   0x6   :  { %p896_p3 = por %p895_p2, %p894_p1 }
   0x8   :  { %p897_p4 = pnand %p896_p3, %p890_p0 }
   0xa   :  { %900 = shalt.err (!%p897_p4)
}
   0xb   :  { %s939_s8 = smov [#allocation2]   ;;  %s901_s9 = scalar_lea.vmem %s36_s29, 16 }
   0xc   :  { %28 = dma.vmem_to_smem %s26_s26, 16, %s939_s8, [#allocation4]  }
   0xd   :  { %p902_p5 = scmp.ne.s32.totalorder %s36_s29, %s901_s9  ;;  %p906_p6 = scmp.lt.s32.totalorder %s36_s29, %s36_s29 }
   0xe   :  { %p907_p7 = scmp.lt.s32.totalorder %s901_s9, %s901_s9 }
  0x10   :  { %p908_p8 = por %p907_p7, %p906_p6 }
  0x12   :  { %p909_p9 = pnand %p908_p8, %p902_p5 }
  0x14   :  { %912 = shalt.err (!%p909_p9)
}
  0x15   :  { %s940_s2 = smov [#allocation5]  }
  0x16   :  { %38 = dma.vmem_to_smem %s36_s29, 16, %s940_s2, [#allocation6]  }
  0x17   :  { %933 = dma.done.wait [#allocation4], 16  }
  0x18   :  { %934 = vsyncadd [#allocation4], 4294967280 }
  0x19   :  { %935 = dma.done.wait [#allocation6], 16  }
  0x1a   :  { %936 = vsyncadd [#allocation6], 4294967280 }
  0x1b   :  { %51 = sfence }
  0x1c   :  { %v52_v0 = vld [vmem:[%s1313_s0] sm:$0xf]  ;;  %v941_v1 = vmov 0   ;;  %v75_v3 = vlaneseq  ;;  %v942_v4 = vmov 1966171168   ;;  %s1183_s23 = sld [smem:[#allocation2]] }
  0x1d   :  { %888 = vset.pattern.permute.xlu0 %v941_v1  ;;  %v53_v2 = vld [vmem:[%s1314_s1] sm:$0xf]  ;;  %v73_v5 = vunpack.c.l.s4 %v942_v4  ;;  %v824_v7 = vld [vmem:[%s1317_s4 + $0x8] ss:$4 sm:$0x3]  ;;  %s1185_s24 = sld [smem:[#allocation2 + $0x1]] }
  0x1e   :  { %63 = vperm.xlu0 %888, %v52_v0   ;;  %v54_v6 = vld [vmem:[%s1317_s4] ss:$4 sm:$0x3]  ;;  %v76_v8 = vshrl.u32 %v75_v3, 7  ;;  %s1191_s25 = sld [smem:[#allocation2 + $0x2]]  ;;  %vm1285_vm0 = vcmp.lt.s32.totalorder %v75_v3, 256 }
  0x1f   :  { %v825_v9 = vld [vmem:[%s1317_s4 + $0x10] ss:$4 sm:$0x3]  ;;  %v826_v10 = vld [vmem:[%s1317_s4 + $0x18] ss:$4 sm:$0x3]  ;;  %v74_v15 = vunpack.c.0.s8 %v73_v5  ;;  %v70_v22 = vcombine.low %v54_v6, %v824_v7 }
  0x20   :  { %v106_v11 = vld [vmem:[%s1319_s6] ss:$8 sm:$0x3]  ;;  %v827_v12 = vld [vmem:[%s1319_s6 + $0x10] ss:$8 sm:$0x3]  ;;  %v71_v25 = vcombine.low %v825_v9, %v826_v10 }
  0x21   :  { %v828_v13 = vld [vmem:[%s1319_s6 + $0x20] ss:$8 sm:$0x3]  ;;  %v829_v14 = vld [vmem:[%s1319_s6 + $0x30] ss:$8 sm:$0x3]  ;;  %v1047_v26 = vsub.s32 %v74_v15, %v76_v8  ;;  %v122_v27 = vcombine.low %v106_v11, %v827_v12 }
  0x22   :  { %115 = vperm.xlu0 %888, %v53_v2   ;;  %v830_v16 = vld [vmem:[%s1317_s4 + $0x1] ss:$4 sm:$0x3]  ;;  %v831_v17 = vld [vmem:[%s1317_s4 + $0x9] ss:$4 sm:$0x3]  ;;  %v123_v28 = vcombine.low %v828_v13, %v829_v14 }
  0x23   :  { %v832_v18 = vld [vmem:[%s1317_s4 + $0x11] ss:$4 sm:$0x3]  ;;  %v833_v19 = vld [vmem:[%s1317_s4 + $0x19] ss:$4 sm:$0x3]  ;;  %v172_v29 = vcombine.low %v830_v16, %v831_v17  ;;  %v78_v33 = vrot.slane %v70_v22, %v1047_v26  ;;  %v85_v34 = vrot.slane %v71_v25, %v1047_v26  ;;  %v130_v35 = vrot.slane %v122_v27, %v1047_v26 }
  0x24   :  { %v834_v20 = vld [vmem:[%s1319_s6 + $0x1] ss:$8 sm:$0x3]  ;;  %v835_v21 = vld [vmem:[%s1319_s6 + $0x11] ss:$8 sm:$0x3]  ;;  %v173_v30 = vcombine.low %v832_v18, %v833_v19  ;;  %v137_v36 = vrot.slane %v123_v28, %v1047_v26 }
  0x25   :  { %v836_v23 = vld [vmem:[%s1319_s6 + $0x21] ss:$8 sm:$0x3]  ;;  %v837_v24 = vld [vmem:[%s1319_s6 + $0x31] ss:$8 sm:$0x3]  ;;  %v220_v31 = vcombine.low %v834_v20, %v835_v21  ;;  %v180_v37 = vrot.slane %v172_v29, %v1047_v26  ;;  %v86_v43 = vcombine.low %v78_v33, %v85_v34  ;;  %v87_v44 = vcombine.high %v78_v33, %v85_v34 }
  0x26   :  { %v221_v32 = vcombine.low %v836_v23, %v837_v24  ;;  %v187_v38 = vrot.slane %v173_v30, %v1047_v26  ;;  %v838_v41 = vld [vmem:[%s1317_s4 + $0x2] ss:$4 sm:$0x3]  ;;  %v839_v42 = vld [vmem:[%s1317_s4 + $0xa] ss:$4 sm:$0x3]  ;;  %v138_v45 = vcombine.low %v130_v35, %v137_v36  ;;  %v139_v46 = vcombine.high %v130_v35, %v137_v36 }
  0x27   :  { %v1056_v39 = vrot.slane %v220_v31, %v1047_v26  ;;  %v840_v47 = vld [vmem:[%s1317_s4 + $0x12] ss:$4 sm:$0x3]  ;;  %v841_v48 = vld [vmem:[%s1317_s4 + $0x1a] ss:$4 sm:$0x3]  ;;  %v270_v56 = vcombine.low %v838_v41, %v839_v42  ;;  %v1136_v10 = vrot.slane %v86_v43, %v1047_v26  ;;  %v1139_v11 = vrot.slane %v87_v44, %v1047_v26 }
  0x28   :  { %v1059_v40 = vrot.slane %v221_v32, %v1047_v26  ;;  %v188_v49 = vcombine.low %v180_v37, %v187_v38  ;;  %v189_v50 = vcombine.high %v180_v37, %v187_v38  ;;  %v842_v51 = vld [vmem:[%s1319_s6 + $0x2] ss:$8 sm:$0x3]  ;;  %v843_v52 = vld [vmem:[%s1319_s6 + $0x12] ss:$8 sm:$0x3]  ;;  %v1142_v12 = vrot.slane %v138_v45, %v1047_v26 }
  0x29   :  { %v844_v53 = vld [vmem:[%s1319_s6 + $0x22] ss:$8 sm:$0x3]  ;;  %v845_v54 = vld [vmem:[%s1319_s6 + $0x32] ss:$8 sm:$0x3]  ;;  %v1145_v13 = vrot.slane %v139_v46, %v1047_v26  ;;  %v271_v20 = vcombine.low %v840_v47, %v841_v48  ;;  %v278_v24 = vrot.slane %v270_v56, %v1047_v26  ;;  %v318_v25 = vcombine.low %v842_v51, %v843_v52 }
  0x2a   :  { %v236_v55 = vcombine.low %v1056_v39, %v1059_v40  ;;  %v846_v57 = vld [vmem:[%s1317_s4 + $0x3] ss:$4 sm:$0x3]  ;;  %v847_v58 = vld [vmem:[%s1317_s4 + $0xb] ss:$4 sm:$0x3]  ;;  %v1157_v17 = vrot.slane %v188_v49, %v1047_v26  ;;  %v1160_v18 = vrot.slane %v189_v50, %v1047_v26  ;;  %v237_v19 = vcombine.high %v1056_v39, %v1059_v40 }
  0x2b   :  { %v848_v59 = vld [vmem:[%s1317_s4 + $0x13] ss:$4 sm:$0x3]  ;;  %v849_v60 = vld [vmem:[%s1317_s4 + $0x1b] ss:$4 sm:$0x3]  ;;  %v319_v27 = vcombine.low %v844_v53, %v845_v54  ;;  %v368_v30 = vcombine.low %v846_v57, %v847_v58  ;;  %v285_v40 = vrot.slane %v271_v20, %v1047_v26  ;;  %v326_v43 = vrot.slane %v318_v25, %v1047_v26 }
  0x2c   :  { %v850_v61 = vld [vmem:[%s1319_s6 + $0x3] ss:$8 sm:$0x3]  ;;  %v851_v62 = vld [vmem:[%s1319_s6 + $0x13] ss:$8 sm:$0x3]  ;;  %v1171_v23 = vrot.slane %v236_v55, %v1047_v26  ;;  %v369_v31 = vcombine.low %v848_v59, %v849_v60  ;;  %v1188_v39 = vrot.slane %v237_v19, %v1047_v26 }
  0x2d   :  { %v852_v63 = vld [vmem:[%s1319_s6 + $0x23] ss:$8 sm:$0x3]  ;;  %v853_v0 = vld [vmem:[%s1319_s6 + $0x33] ss:$8 sm:$0x3]  ;;  %v416_v32 = vcombine.low %v850_v61, %v851_v62  ;;  %v333_v44 = vrot.slane %v319_v27, %v1047_v26  ;;  %v376_v47 = vrot.slane %v368_v30, %v1047_v26  ;;  %v286_v55 = vcombine.low %v278_v24, %v285_v40 }
  0x2e   :  { %v454_v1 = vld [vmem:[%s1318_s5] ss:$2 sm:$0x3]  ;;  %v854_v2 = vld [vmem:[%s1318_s5 + $0x4] ss:$2 sm:$0x3]  ;;  %v417_v33 = vcombine.low %v852_v63, %v853_v0  ;;  %v383_v48 = vrot.slane %v369_v31, %v1047_v26  ;;  %v287_v56 = vcombine.high %v278_v24, %v285_v40  ;;  %v660_v40 = vstv %s1191_s25 }
  0x2f   :  { %v855_v4 = vld [vmem:[%s1318_s5 + $0x8] ss:$2 sm:$0x3]  ;;  %v856_v5 = vld [vmem:[%s1318_s5 + $0xc] ss:$2 sm:$0x3]  ;;  %v465_v35 = vcombine.low %v454_v1, %v854_v2  ;;  %v424_v49 = vrot.slane %v416_v32, %v1047_v26  ;;  %v334_v59 = vcombine.low %v326_v43, %v333_v44  ;;  %v335_v60 = vcombine.high %v326_v43, %v333_v44 }
  0x30   :  { %v857_v6 = vld [vmem:[%s1319_s6 + $0x4] ss:$8 sm:$0x3]  ;;  %v858_v7 = vld [vmem:[%s1319_s6 + $0x14] ss:$8 sm:$0x3]  ;;  %v466_v36 = vcombine.low %v855_v4, %v856_v5  ;;  %v431_v50 = vrot.slane %v417_v33, %v1047_v26  ;;  %v384_v63 = vcombine.low %v376_v47, %v383_v48  ;;  %v385_v0 = vcombine.high %v376_v47, %v383_v48 }
  0x31   :  { %v859_v8 = vld [vmem:[%s1319_s6 + $0x24] ss:$8 sm:$0x3]  ;;  %v860_v9 = vld [vmem:[%s1319_s6 + $0x34] ss:$8 sm:$0x3]  ;;  %v513_v37 = vcombine.low %v857_v6, %v858_v7  ;;  %v473_v51 = vrot.slane %v465_v35, %v1047_v26  ;;  %v349_v19 = vrot.slane %v335_v60, %v1047_v26  ;;  %v654_v35 = vstv %s1185_s24 }
  0x32   :  { %v861_v14 = vld [vmem:[%s1318_s5 + $0x1] ss:$2 sm:$0x3]  ;;  %v862_v15 = vld [vmem:[%s1318_s5 + $0x5] ss:$2 sm:$0x3]  ;;  %v514_v38 = vcombine.low %v859_v8, %v860_v9  ;;  %v480_v52 = vrot.slane %v466_v36, %v1047_v26  ;;  %v432_v1 = vcombine.low %v424_v49, %v431_v50  ;;  %v433_v2 = vcombine.high %v424_v49, %v431_v50 }
  0x33   :  { %v863_v16 = vld [vmem:[%s1318_s5 + $0x9] ss:$2 sm:$0x3]  ;;  %v864_v21 = vld [vmem:[%s1318_s5 + $0xd] ss:$2 sm:$0x3]  ;;  %v563_v41 = vcombine.low %v861_v14, %v862_v15  ;;  %v521_v53 = vrot.slane %v513_v37, %v1047_v26  ;;  %v294_v8 = vrot.slane %v286_v55, %v1047_v26  ;;  %v301_v9 = vrot.slane %v287_v56, %v1047_v26 }
  0x34   :  { %v865_v22 = vld [vmem:[%s1319_s6 + $0x5] ss:$8 sm:$0x3]  ;;  %v866_v28 = vld [vmem:[%s1319_s6 + $0x15] ss:$8 sm:$0x3]  ;;  %v564_v42 = vcombine.low %v863_v16, %v864_v21  ;;  %v528_v54 = vrot.slane %v514_v38, %v1047_v26  ;;  %v481_v4 = vcombine.low %v473_v51, %v480_v52  ;;  %v482_v5 = vcombine.high %v473_v51, %v480_v52 }
  0x35   :  { %v867_v29 = vld [vmem:[%s1319_s6 + $0x25] ss:$8 sm:$0x3]  ;;  %v868_v34 = vld [vmem:[%s1319_s6 + $0x35] ss:$8 sm:$0x3]  ;;  %v611_v45 = vcombine.low %v865_v22, %v866_v28  ;;  %v571_v57 = vrot.slane %v563_v41, %v1047_v26  ;;  %v342_v16 = vrot.slane %v334_v59, %v1047_v26  ;;  %v392_v22 = vrot.slane %v384_v63, %v1047_v26 }
  0x36   :  { %v612_v46 = vcombine.low %v867_v29, %v868_v34  ;;  %s1195_s6 = sld [smem:[#allocation2 + $0x3]]  ;;  %v578_v58 = vrot.slane %v564_v42, %v1047_v26  ;;  %v529_v6 = vcombine.low %v521_v53, %v528_v54  ;;  %v530_v7 = vcombine.high %v521_v53, %v528_v54  ;;  %s943_s11 = smov [#allocation7]  }
  0x37   :  { %s1201_s26 = sld [smem:[#allocation2 + $0x4]]  ;;  %v619_v61 = vrot.slane %v611_v45, %v1047_v26  ;;  %v399_v24 = vrot.slane %v385_v0, %v1047_v26  ;;  %v440_v25 = vrot.slane %v432_v1, %v1047_v26  ;;  %v447_v27 = vrot.slane %v433_v2, %v1047_v26  ;;  %s811_s12 = sshll.u32 %s943_s11, 4  ;;  %s812_s12 = int_to_ptr.vmem [resolvable:$true] %s811_s12 }
  0x38   :  { %s1207_s27 = sld [smem:[#allocation2 + $0x5]]  ;;  %v626_v62 = vrot.slane %v612_v46, %v1047_v26  ;;  %v579_v14 = vcombine.low %v571_v57, %v578_v58  ;;  %v580_v15 = vcombine.high %v571_v57, %v578_v58  ;;  %v489_v28 = vrot.slane %v481_v4, %v1047_v26  ;;  %s913_s13 = scalar_lea.vmem %s812_s12, 256 }
  0x39   :  { %s1211_s28 = sld [smem:[#allocation2 + $0x6]]  ;;  %v496_v29 = vrot.slane %v482_v5, %v1047_v26  ;;  %v537_v30 = vrot.slane %v529_v6, %v1047_v26  ;;  %v544_v31 = vrot.slane %v530_v7, %v1047_v26  ;;  %v650_v34 = vstv %s1183_s23  ;;  %p914_p10 = scmp.ne.s32.totalorder %s812_s12, %s913_s13 }
  0x3a   :  { %s1215_s29 = sld [smem:[#allocation2 + $0x7]]  ;;  %v627_v20 = vcombine.low %v619_v61, %v626_v62  ;;  %v628_v21 = vcombine.high %v619_v61, %v626_v62  ;;  %v587_v32 = vrot.slane %v579_v14, %v1047_v26  ;;  %v594_v33 = vrot.slane %v580_v15, %v1047_v26  ;;  %p918_p11 = scmp.lt.s32.totalorder %s812_s12, %s812_s12 }
  0x3b   :  { %s1217_s30 = sld [smem:[#allocation2 + $0x8]]  ;;  %p919_p12 = scmp.lt.s32.totalorder %s913_s13, %s913_s13 }
  0x3c   :  { %s1219_s8 = sld [smem:[#allocation2 + $0x9]]  ;;  %v635_v37 = vrot.slane %v627_v20, %v1047_v26  ;;  %v642_v38 = vrot.slane %v628_v21, %v1047_v26  ;;  %v666_v41 = vstv %s1195_s6 }
  0x3d   :  { %v672_v42 = vstv %s1201_s26  ;;  %s1251_s9 = sld [smem:[#allocation2 + $0xa]]  ;;  %p920_p13 = por %p919_p12, %p918_p11 }
  0x3e   :  { %v678_v43 = vstv %s1207_s27  ;;  %s1257_s2 = sld [smem:[#allocation5]] }
  0x3f   :  { %v730_v44 = vstv %s1211_s28  ;;  %s1259_s3 = sld [smem:[#allocation2 + $0xb]]  ;;  %p921_p0 = pnand %p920_p13, %p914_p10 }
  0x40   :  { %v734_v45 = vstv %s1215_s29  ;;  %s1267_s10 = sld [smem:[#allocation5 + $0x1]] }
  0x41   :  { %v740_v48 = vstv %s1217_s30 }
  0x42   :  { %v746_v49 = vstv %s1219_s8 }
  0x99   :  { %v64_v36 = vpop.permute.xlu0 %63 }
  0x9a   :  { %v104_v46 = vmul.f32 %v1136_v10, %v64_v36  ;;  %v105_v47 = vmul.f32 %v1139_v11, %v64_v36  ;;  %v206_v50 = vmul.f32 %v1157_v17, %v64_v36  ;;  %v207_v51 = vmul.f32 %v1160_v18, %v64_v36 }
  0x9b   :  { %v304_v52 = vmul.f32 %v294_v8, %v64_v36  ;;  %v305_v53 = vmul.f32 %v301_v9, %v64_v36  ;;  %v402_v54 = vmul.f32 %v392_v22, %v64_v36  ;;  %v403_v55 = vmul.f32 %v399_v24, %v64_v36 }
  0x9c   :  { %v499_v56 = vmul.f32 %v489_v28, %v64_v36  ;;  %v500_v57 = vmul.f32 %v496_v29, %v64_v36  ;;  %v752_v28 = vstv %s1251_s9 }
  0x9d   :  { %v116_v58 = vpop.permute.xlu0 %115 }
  0x9e   :  { %v156_v59 = vmul.f32 %v1142_v12, %v116_v58  ;;  %v157_v10 = vmul.f32 %v1145_v13, %v116_v58  ;;  %v254_v11 = vmul.f32 %v1171_v23, %v116_v58  ;;  %v255_v60 = vmul.f32 %v1188_v39, %v116_v58 }
  0x9f   :  { %v352_v17 = vmul.f32 %v342_v16, %v116_v58  ;;  %v353_v18 = vmul.f32 %v349_v19, %v116_v58  ;;  %v450_v61 = vmul.f32 %v440_v25, %v116_v58  ;;  %v451_v62 = vmul.f32 %v447_v27, %v116_v58 }
  0xa0   :  { %v158_v63 = vadd.f32 %v156_v59, %v104_v46  ;;  %v159_v0 = vadd.f32 %v157_v10, %v105_v47  ;;  %v256_v1 = vadd.f32 %v254_v11, %v206_v50  ;;  %v257_v2 = vadd.f32 %v255_v60, %v207_v51 }
  0xa1   :  { %v354_v4 = vadd.f32 %v352_v17, %v304_v52  ;;  %v355_v5 = vadd.f32 %v353_v18, %v305_v53  ;;  %v452_v6 = vadd.f32 %v450_v61, %v402_v54  ;;  %v453_v12 = vadd.f32 %v451_v62, %v403_v55 }
  0xa2   :  { %v547_v7 = vmul.f32 %v537_v30, %v116_v58  ;;  %v548_v13 = vmul.f32 %v544_v31, %v116_v58  ;;  %v645_v23 = vmul.f32 %v635_v37, %v116_v58  ;;  %v646_v8 = vmul.f32 %v642_v38, %v116_v58 }
  0xa3   :  { %v651_v39 = vmul.f32 %v650_v34, %v158_v63  ;;  %v652_v9 = vmul.f32 %v650_v34, %v159_v0  ;;  %v655_v14 = vmul.f32 %v654_v35, %v256_v1  ;;  %v656_v15 = vmul.f32 %v654_v35, %v257_v2 }
  0xa4   :  { %v597_v16 = vmul.f32 %v587_v32, %v64_v36  ;;  %v598_v19 = vmul.f32 %v594_v33, %v64_v36  ;;  %v549_v20 = vadd.f32 %v547_v7, %v499_v56  ;;  %v550_v21 = vadd.f32 %v548_v13, %v500_v57 }
  0xa5   :  { %v657_v22 = vadd.f32 %v655_v14, %v651_v39  ;;  %v658_v24 = vadd.f32 %v656_v15, %v652_v9  ;;  %v661_v25 = vmul.f32 %v660_v40, %v354_v4  ;;  %v662_v27 = vmul.f32 %v660_v40, %v355_v5 }
  0xa6   :  { %v647_v29 = vadd.f32 %v645_v23, %v597_v16  ;;  %v648_v30 = vadd.f32 %v646_v8, %v598_v19  ;;  %v684_v31 = vstv %s1257_s2  ;;  %v667_v32 = vmul.f32 %v666_v41, %v452_v6 }
  0xa7   :  { %v663_v34 = vadd.f32 %v661_v25, %v657_v22  ;;  %v664_v35 = vadd.f32 %v662_v27, %v658_v24  ;;  %v668_v33 = vmul.f32 %v666_v41, %v453_v12  ;;  %v731_v36 = vmul.f32 %v730_v44, %v158_v63 }
  0xa8   :  { %v732_v37 = vmul.f32 %v730_v44, %v159_v0  ;;  %v735_v38 = vmul.f32 %v734_v45, %v256_v1  ;;  %v736_v46 = vmul.f32 %v734_v45, %v257_v2  ;;  %v673_v50 = vmul.f32 %v672_v42, %v549_v20 }
  0xa9   :  { %v669_v47 = vadd.f32 %v667_v32, %v663_v34  ;;  %v670_v40 = vadd.f32 %v668_v33, %v664_v35  ;;  %v674_v51 = vmul.f32 %v672_v42, %v550_v21  ;;  %v741_v41 = vmul.f32 %v740_v48, %v354_v4 }
  0xaa   :  { %v737_v52 = vadd.f32 %v735_v38, %v731_v36  ;;  %v738_v53 = vadd.f32 %v736_v46, %v732_v37  ;;  %v742_v54 = vmul.f32 %v740_v48, %v355_v5  ;;  %v679_v45 = vmul.f32 %v678_v43, %v647_v29 }
  0xab   :  { %v675_v44 = vadd.f32 %v673_v50, %v669_v47  ;;  %v676_v55 = vadd.f32 %v674_v51, %v670_v40  ;;  %v680_v56 = vmul.f32 %v678_v43, %v648_v30  ;;  %v747_v59 = vmul.f32 %v746_v49, %v452_v6 }
  0xac   :  { %v743_v57 = vadd.f32 %v741_v41, %v737_v52  ;;  %v744_v58 = vadd.f32 %v742_v54, %v738_v53  ;;  %v748_v42 = vmul.f32 %v746_v49, %v453_v12  ;;  %v758_v10 = vstv %s1259_s3 }
  0xad   :  { %v681_v11 = vadd.f32 %v679_v45, %v675_v44  ;;  %v682_v60 = vadd.f32 %v680_v56, %v676_v55  ;;  %v753_v61 = vmul.f32 %v752_v28, %v549_v20  ;;  %v754_v48 = vmul.f32 %v752_v28, %v550_v21 }
  0xae   :  { %v749_v17 = vadd.f32 %v747_v59, %v743_v57  ;;  %v750_v18 = vadd.f32 %v748_v42, %v744_v58  ;;  %v759_v2 = vmul.f32 %v758_v10, %v647_v29  ;;  %v760_v43 = vmul.f32 %v758_v10, %v648_v30 }
  0xaf   :  { %v685_v62 = vadd.f32 %v684_v31, %v681_v11  ;;  %v686_v63 = vadd.f32 %v684_v31, %v682_v60  ;;  %v764_v5 = vstv %s1267_s10 }
  0xb0   :  { %v755_v0 = vadd.f32 %v753_v61, %v749_v17  ;;  %v756_v1 = vadd.f32 %v754_v48, %v750_v18 }
  0xb1   :  { %v689_v4 = vcombine.low %v685_v62, %v686_v63 }
  0xb2   :  { %v761_v7 = vadd.f32 %v759_v2, %v755_v0  ;;  %v762_v6 = vadd.f32 %v760_v43, %v756_v1 }
  0xb3   :  { %v696_v13 = vrot.slane %v689_v4, %v1047_v26 }
  0xb4   :  { %v765_v12 = vadd.f32 %v764_v5, %v761_v7  ;;  %v766_v23 = vadd.f32 %v764_v5, %v762_v6 }
  0xb5   :  { %v697_v8 = vcombine.high %v696_v13, %v696_v13  ;;  %v704_v39 = vrot.slane %v696_v13, %v1047_v26 }
  0xb6   :  { %v769_v9 = vcombine.low %v765_v12, %v766_v23 }
  0xb7   :  { %v711_v14 = vrot.slane %v697_v8, %v1047_v26  ;;  %v712_v15 = vcombine.high %v704_v39, %v704_v39  ;;  %722 = vst.msk [vmem:[#allocation7] ss:$2 sm:$0x3] %vm1285_vm0, %v704_v39 }
  0xb8   :  { %v776_v16 = vrot.slane %v769_v9, %v1047_v26 }
  0xb9   :  { %v713_v19 = vcombine.high %v711_v14, %v711_v14  ;;  %724 = vst.msk [vmem:[#allocation7 + $0x4] ss:$2 sm:$0x3] %vm1285_vm0, %v711_v14  ;;  %726 = vst.msk [vmem:[#allocation7 + $0x8] ss:$2 sm:$0x3] %vm1285_vm0, %v712_v15 }
  0xba   :  { %v777_v3 = vcombine.high %v776_v16, %v776_v16  ;;  %v784_v20 = vrot.slane %v776_v16, %v1047_v26 }
  0xbb   :  { %728 = vst.msk [vmem:[#allocation7 + $0xc] ss:$2 sm:$0x3] %vm1285_vm0, %v713_v19 }
  0xbc   :  { %v791_v21 = vrot.slane %v777_v3, %v1047_v26  ;;  %v792_v22 = vcombine.high %v784_v20, %v784_v20  ;;  %799 = vst.msk [vmem:[#allocation7 + $0x1] ss:$2 sm:$0x3] %vm1285_vm0, %v784_v20 }
  0xbe   :  { %v793_v24 = vcombine.high %v791_v21, %v791_v21  ;;  %801 = vst.msk [vmem:[#allocation7 + $0x5] ss:$2 sm:$0x3] %vm1285_vm0, %v791_v21  ;;  %803 = vst.msk [vmem:[#allocation7 + $0x9] ss:$2 sm:$0x3] %vm1285_vm0, %v792_v22 }
  0xc0   :  { %805 = vst.msk [vmem:[#allocation7 + $0xd] ss:$2 sm:$0x3] %vm1285_vm0, %v793_v24 }
  0xc1   :  { %924 = shalt.err (!%p921_p0)
}
  0xc2   :  { %s944_s14 = smov 64   ;;  %s945_s15 = smov 4  }
  0xc3   :  { %817 = dma.vmem_to_hbm [thread:$0]  %s812_s12, 256, %s1320_s7, [#allocation3], %s944_s14, %s944_s14, %s945_s15  }
  0xc4   :  { %937 = dma.done.wait [#allocation3], 256  }
  0xc5   :  { %938 = vsyncadd [#allocation3], 4294967040 }
  0xc6   :  { %821 = vsyncpa [#allocation3], 1 }
  0xc7   :  { %822 = vsyncpa [#allocation4], 1 }
  0xc8   :  { %823 = vsyncpa [#allocation6], 1 }

</bundles_post_ra>
